<compile_context>
chip_gen: v6e
topology: v6e:2x2x1
jax: 0.10.0
libtpu: 0.0.40
codegen_flags: <defaults>
</compile_context>

<pallas_src>
import math

import jax
import jax.numpy as jnp
from jax.experimental import pallas as pl
from jax.experimental.pallas import tpu as pltpu


def _round_up(v, m):
    return ((v + m - 1) // m) * m


def _col_normalize(w, eps=1e-12):
    # F.normalize(w, dim=0): divide each column by max(||col||_2, eps).
    n = jnp.sqrt(jnp.sum(w * w, axis=0, keepdims=True))
    return w / jnp.maximum(n, eps)


def _gcn2_kernel(a_ref, hk_ref, hi_ref, wl_ref, bl_ref, wr_ref, ws_ref, wt_ref,
                 out1_ref, outs_ref, outt_ref, acc_ref):
    """Accumulate mean-aggregation over the k grid axis; finalize on the last k step."""
    k = pl.program_id(1)

    @pl.when(k == 0)
    def _():
        acc_ref[...] = jnp.zeros_like(acc_ref)

    # Mean-neighbor aggregation partial sum: bf16 A-tile @ bf16 h-tile, f32 accumulate.
    acc_ref[...] += jnp.dot(a_ref[...], hk_ref[...],
                            preferred_element_type=jnp.float32)

    @pl.when(k == pl.num_programs(1) - 1)
    def _():
        agg = acc_ref[...]
        h_i = hi_ref[...]

        # SAGEConv (mean aggregation, root_weight=True):
        #   out1 = W_l @ mean_{j in N(i)} h_j + b_l + W_r @ h_i
        out1 = (jnp.dot(agg, wl_ref[...], preferred_element_type=jnp.float32)
                + bl_ref[...]
                + jnp.dot(h_i, wr_ref[...], preferred_element_type=jnp.float32))
        out1_ref[...] = out1

        # F.normalize(out1, dim=1) == out1 / max(||row||_2, 1e-12); rsqrt -> EUP slot.
        eps = 1e-12
        sq = jnp.sum(out1 * out1, axis=1, keepdims=True)
        xn = out1 * jax.lax.rsqrt(jnp.maximum(sq, eps * eps))

        # NormedLinear heads (weights pre-column-normalized + 128-lane-padded in wrapper).
        outs_ref[...] = jnp.dot(xn, ws_ref[...], preferred_element_type=jnp.float32)
        outt_ref[...] = jnp.dot(xn, wt_ref[...], preferred_element_type=jnp.float32)


def classifier_gcn2_forward(x, edge_index, params, *, tm=256, tk=512, interpret=False):
    """Glue: ReLU + dense mean adjacency + padding in XLA, then the tiled Pallas kernel."""
    wl, bl, wr, ws, wt = params
    N, hid = x.shape
    n_shared = ws.shape[1]
    n_total = wt.shape[1]

    # ---- wrapper-side prep (plain XLA) --------------------------------------------------
    h = jnp.maximum(x.astype(jnp.float32), 0.0)

    # Dense mean-aggregation adjacency: A[dst, src] = count / in-degree(dst).
    # (Duplicate edges counted, zero-in-degree rows -> zero aggregate; matches PyG SAGEConv.)
    # TODO(synk): replace with a CSR / PrefetchScalarGridSpec DMA-gather formulation for
    #             large sparse graphs (drops the O(N^2) adjacency and the scatter-add).
    src, dst = edge_index[0], edge_index[1]
    adj = jnp.zeros((N, N), jnp.float32).at[dst, src].add(1.0)
    deg = jnp.sum(adj, axis=1, keepdims=True)
    a_mean = jnp.where(deg > 0, adj / jnp.maximum(deg, 1.0), 0.0)

    # ---- padding / tiling geometry ------------------------------------------------------
    hid_p = _round_up(hid, 128)
    tm = _round_up(max(8, min(tm, _round_up(N, 8))), 8)          # row tile (sublane axis)
    tk = _round_up(max(128, min(tk, _round_up(N, 128))), 128)    # reduction tile (lane axis)
    n_pad = _round_up(N, math.lcm(tm, tk))
    cs_pad = _round_up(n_shared, 128)                            # lane-dense classifier out
    ct_pad = _round_up(n_total, 128)

    a_p = jnp.zeros((n_pad, n_pad), jnp.bfloat16).at[:N, :N].set(a_mean.astype(jnp.bfloat16))
    h_p = jnp.zeros((n_pad, hid_p), jnp.float32).at[:N, :hid].set(h)
    h_bf = h_p.astype(jnp.bfloat16)

    f32 = jnp.float32
    wl_p = jnp.zeros((hid_p, hid_p), f32).at[:hid, :hid].set(wl.astype(f32))
    wr_p = jnp.zeros((hid_p, hid_p), f32).at[:hid, :hid].set(wr.astype(f32))
    bl_p = jnp.zeros((1, hid_p), f32).at[:, :hid].set(bl.reshape(1, -1).astype(f32))
    # Hoist NormedLinear column-normalization out of the kernel (it would otherwise be
    # recomputed every grid step), and zero-pad the class dim to a multiple of 128.
    ws_p = jnp.zeros((hid_p, cs_pad), f32).at[:hid, :n_shared].set(_col_normalize(ws.astype(f32)))
    wt_p = jnp.zeros((hid_p, ct_pad), f32).at[:hid, :n_total].set(_col_normalize(wt.astype(f32)))

    grid = (n_pad // tm, n_pad // tk)

    def _full(shape):
        return pl.BlockSpec(shape, lambda i, k: (0,) * len(shape))

    in_specs = [
        pl.BlockSpec((tm, tk), lambda i, k: (i, k)),        # A tile           (bf16)
        pl.BlockSpec((tk, hid_p), lambda i, k: (k, 0)),     # h k-tile         (bf16)
        pl.BlockSpec((tm, hid_p), lambda i, k: (i, 0)),     # h i-tile (root)  (f32)
        _full((hid_p, hid_p)),                              # W_l
        _full((1, hid_p)),                                  # b_l
        _full((hid_p, hid_p)),                              # W_r
        _full((hid_p, cs_pad)),                             # normalized W_s
        _full((hid_p, ct_pad)),                             # normalized W_t
    ]
    out_specs = (
        pl.BlockSpec((tm, hid_p), lambda i, k: (i, 0)),     # out1
        pl.BlockSpec((tm, cs_pad), lambda i, k: (i, 0)),    # out_s (padded, lane-dense)
        pl.BlockSpec((tm, ct_pad), lambda i, k: (i, 0)),    # out_t (padded, lane-dense)
    )
    out_shapes = (
        jax.ShapeDtypeStruct((n_pad, hid_p), f32),
        jax.ShapeDtypeStruct((n_pad, cs_pad), f32),
        jax.ShapeDtypeStruct((n_pad, ct_pad), f32),
    )

    # Advisory cost estimate so XLA schedules surrounding ops sensibly.
    flops = (2 * n_pad * n_pad * hid_p
             + 2 * 2 * n_pad * hid_p * hid_p
             + 2 * n_pad * hid_p * (cs_pad + ct_pad))
    bytes_accessed = (2 * n_pad * n_pad
                      + (2 + 4) * n_pad * hid_p
                      + 4 * n_pad * (hid_p + cs_pad + ct_pad))
    cost = pl.CostEstimate(flops=flops, transcendentals=n_pad,
                           bytes_accessed=bytes_accessed)

    # Explicit scoped-VMEM budget: double-buffered streamed tiles + residents, with
    # headroom, capped well under v7x's 64 MiB physical VMEM.
    tile_bytes = (2 * (tm * tk * 2 + tk * hid_p * 2)                      # A + h_k (x2 bufs)
                  + tm * hid_p * 4                                        # h_i resident
                  + tm * (hid_p + cs_pad + ct_pad) * 4                    # resident outputs
                  + tm * hid_p * 4                                        # accumulator scratch
                  + (2 * hid_p * hid_p + hid_p * (1 + cs_pad + ct_pad)) * 4)  # weights
    vmem_limit = int(min(max(2 * tile_bytes, 8 * 1024 * 1024), 48 * 1024 * 1024))

    out1_p, outs_p, outt_p = pl.pallas_call(
        _gcn2_kernel,
        out_shape=out_shapes,
        grid_spec=pltpu.PrefetchScalarGridSpec(
            num_scalar_prefetch=0,
            grid=grid,
            in_specs=in_specs,
            out_specs=out_specs,
            scratch_shapes=[pltpu.VMEM((tm, hid_p), jnp.float32)],
        ),
        compiler_params=pltpu.CompilerParams(
            dimension_semantics=("parallel", "arbitrary"),
            vmem_limit_bytes=vmem_limit,
        ),
        cost_estimate=cost,
        interpret=interpret,
    )(a_p, h_bf, h_p, wl_p, bl_p, wr_p, ws_p, wt_p)

    out1 = out1_p[:N, :hid]
    out_s = outs_p[:N, :n_shared]
    out_t = outt_p[:N, :n_total]
    return out1, out_s, out_t


def init_params(key, hid_dim, shared_classes, total_classes):
    """Deterministic synthetic parameters (shapes match the PyTorch module)."""
    k = jax.random.split(key, 5)
    s = 1.0 / jnp.sqrt(jnp.float32(hid_dim))
    wl = jax.random.uniform(k[0], (hid_dim, hid_dim), jnp.float32, -s, s)   # SAGEConv lin_l
    bl = jax.random.uniform(k[1], (1, hid_dim), jnp.float32, -s, s)         # SAGEConv lin_l bias
    wr = jax.random.uniform(k[2], (hid_dim, hid_dim), jnp.float32, -s, s)   # SAGEConv lin_r (no bias)
    ws = jax.random.uniform(k[3], (hid_dim, shared_classes), jnp.float32, -1.0, 1.0)  # linear_s
    wt = jax.random.uniform(k[4], (hid_dim, total_classes), jnp.float32, -1.0, 1.0)   # linear_t
    return (wl, bl, wr, ws, wt)


def _reference_forward(x, edge_index, params):
    """Pure-JAX reference (f32 everywhere) mirroring the PyTorch forward."""
    wl, bl, wr, ws, wt = params
    N = x.shape[0]
    h = jnp.maximum(x, 0.0)
    src, dst = edge_index[0], edge_index[1]
    adj = jnp.zeros((N, N), jnp.float32).at[dst, src].add(1.0)
    deg = jnp.sum(adj, axis=1, keepdims=True)
    a_mean = jnp.where(deg > 0, adj / jnp.maximum(deg, 1.0), 0.0)
    agg = a_mean @ h
    out1 = agg @ wl + bl.reshape(1, -1) + h @ wr

    def nrm(v, axis):
        n = jnp.sqrt(jnp.sum(v * v, axis=axis, keepdims=True))
        return v / jnp.maximum(n, 1e-12)

    xn = nrm(out1, 1)
    return out1, xn @ nrm(ws, 0), xn @ nrm(wt, 0)


if __name__ == "__main__":
    key = jax.random.PRNGKey(0)
    N, hid_dim, shared_classes, total_classes, E = 16, 128, 3, 7, 48

    kx, ksrc, kdst, kp = jax.random.split(key, 4)
    x = jax.random.normal(kx, (N, hid_dim), jnp.float32)
    src = jax.random.randint(ksrc, (E,), 0, N)
    dst = jax.random.randint(kdst, (E,), 0, N)
    edge_index = jnp.stack([src, dst], axis=0)  # [2, E]

    params = init_params(kp, hid_dim, shared_classes, total_classes)

    out1, out_s, out_t = classifier_gcn2_forward(x, edge_index, params)
    jax.block_until_ready((out1, out_s, out_t))

    assert out1.shape == (N, hid_dim)
    assert out_s.shape == (N, shared_classes)
    assert out_t.shape == (N, total_classes)

    # Light numerical check vs. the f32 reference (bf16 aggregation -> loose tolerance).
    r1, rs, rt = _reference_forward(x, edge_index, params)
    assert bool(jnp.allclose(out1, r1, rtol=5e-2, atol=5e-2))
    assert bool(jnp.allclose(out_s, rs, rtol=5e-2, atol=5e-2))
    assert bool(jnp.allclose(out_t, rt, rtol=5e-2, atol=5e-2))

    print("KERNEL_OK")
</pallas_src>

<mosaic_0001>
module attributes {stable_mosaic.version = 11 : i64} {
  func.func @_gcn2_kernel(%arg0: i32, %arg1: i32, %arg2: memref<16x128xbf16, #tpu.memory_space<vmem>>, %arg3: memref<128x128xbf16, #tpu.memory_space<vmem>>, %arg4: memref<16x128xf32, #tpu.memory_space<vmem>>, %arg5: memref<128x128xf32, #tpu.memory_space<vmem>>, %arg6: memref<1x128xf32, #tpu.memory_space<vmem>>, %arg7: memref<128x128xf32, #tpu.memory_space<vmem>>, %arg8: memref<128x128xf32, #tpu.memory_space<vmem>>, %arg9: memref<128x128xf32, #tpu.memory_space<vmem>>, %arg10: memref<16x128xf32, #tpu.memory_space<vmem>>, %arg11: memref<16x128xf32, #tpu.memory_space<vmem>>, %arg12: memref<16x128xf32, #tpu.memory_space<vmem>>, %arg13: memref<16x128xf32, #tpu.memory_space<vmem>>) attributes {dimension_semantics = [#tpu.dimension_semantics<parallel>, #tpu.dimension_semantics<arbitrary>], iteration_bounds = array<i64: 8, 1>, scalar_prefetch = 0 : i64, scratch_operands = 1 : i64, tpu.core_type = #tpu.core_type<tc>, window_params = [{transform_indices = @transform_0, window_bounds = array<i64: 16, 128>}, {transform_indices = @transform_1, window_bounds = array<i64: 128, 128>}, {transform_indices = @transform_2, window_bounds = array<i64: 16, 128>}, {pipeline_mode = #tpu.pipeline_mode<synchronous>, transform_indices = @transform_3, window_bounds = array<i64: 128, 128>}, {pipeline_mode = #tpu.pipeline_mode<synchronous>, transform_indices = @transform_4, window_bounds = array<i64: 1, 128>}, {pipeline_mode = #tpu.pipeline_mode<synchronous>, transform_indices = @transform_5, window_bounds = array<i64: 128, 128>}, {pipeline_mode = #tpu.pipeline_mode<synchronous>, transform_indices = @transform_6, window_bounds = array<i64: 128, 128>}, {pipeline_mode = #tpu.pipeline_mode<synchronous>, transform_indices = @transform_7, window_bounds = array<i64: 128, 128>}, {transform_indices = @transform_8, window_bounds = array<i64: 16, 128>}, {transform_indices = @transform_9, window_bounds = array<i64: 16, 128>}, {transform_indices = @transform_10, window_bounds = array<i64: 16, 128>}]} {
    %c0_i32 = arith.constant 0 : i32
    %0 = arith.cmpi eq, %arg1, %c0_i32 : i32
    %1 = arith.extui %0 : i1 to i32
    %c0_i32_0 = arith.constant 0 : i32
    %2 = arith.cmpi ne, %1, %c0_i32_0 : i32
    scf.if %2 {
      %cst_10 = arith.constant 0.000000e+00 : f32
      %12 = vector.broadcast %cst_10 : f32 to vector<16x128xf32>
      %c0_11 = arith.constant 0 : index
      %c0_12 = arith.constant 0 : index
      %13 = vector.load %arg13[%c0_11, %c0_12] : memref<16x128xf32, #tpu.memory_space<vmem>>, vector<16x128xf32>
      tpu.vector_store %arg13[%c0_11, %c0_12], %12 {strides = array<i32>} : memref<16x128xf32, #tpu.memory_space<vmem>>, vector<16x128xf32>,
    } else {
    }
    %c0 = arith.constant 0 : index
    %c0_1 = arith.constant 0 : index
    %3 = vector.load %arg13[%c0, %c0_1] : memref<16x128xf32, #tpu.memory_space<vmem>>, vector<16x128xf32>
    %c0_2 = arith.constant 0 : index
    %c0_3 = arith.constant 0 : index
    %4 = vector.load %arg2[%c0_2, %c0_3] : memref<16x128xbf16, #tpu.memory_space<vmem>>, vector<16x128xbf16>
    %c0_4 = arith.constant 0 : index
    %c0_5 = arith.constant 0 : index
    %5 = vector.load %arg3[%c0_4, %c0_5] : memref<128x128xbf16, #tpu.memory_space<vmem>>, vector<128x128xbf16>
    %cst = arith.constant dense<0.000000e+00> : vector<16x128xf32>
    %6 = tpu.matmul %4, %5, %cst {dimension_numbers = #tpu.dot_dimension_numbers<[1], [0], [0], [1], [0, 0, 1, 1], [], []>} : vector<16x128xbf16>, vector<128x128xbf16>, vector<16x128xf32> -> vector<16x128xf32>
    %7 = arith.addf %3, %6 : vector<16x128xf32>
    %c0_6 = arith.constant 0 : index
    %c0_7 = arith.constant 0 : index
    %8 = vector.load %arg13[%c0_6, %c0_7] : memref<16x128xf32, #tpu.memory_space<vmem>>, vector<16x128xf32>
    tpu.vector_store %arg13[%c0_6, %c0_7], %7 {strides = array<i32>} : memref<16x128xf32, #tpu.memory_space<vmem>>, vector<16x128xf32>,
    %c0_i32_8 = arith.constant 0 : i32
    %9 = arith.cmpi eq, %arg1, %c0_i32_8 : i32
    %10 = arith.extui %9 : i1 to i32
    %c0_i32_9 = arith.constant 0 : i32
    %11 = arith.cmpi ne, %10, %c0_i32_9 : i32
    scf.if %11 {
      %c0_10 = arith.constant 0 : index
      %c0_11 = arith.constant 0 : index
      %12 = vector.load %arg13[%c0_10, %c0_11] : memref<16x128xf32, #tpu.memory_space<vmem>>, vector<16x128xf32>
      %c0_12 = arith.constant 0 : index
      %c0_13 = arith.constant 0 : index
      %13 = vector.load %arg4[%c0_12, %c0_13] : memref<16x128xf32, #tpu.memory_space<vmem>>, vector<16x128xf32>
      %c0_14 = arith.constant 0 : index
      %c0_15 = arith.constant 0 : index
      %14 = vector.load %arg5[%c0_14, %c0_15] : memref<128x128xf32, #tpu.memory_space<vmem>>, vector<128x128xf32>
      %cst_16 = arith.constant dense<0.000000e+00> : vector<16x128xf32>
      %15 = tpu.matmul %12, %14, %cst_16 {dimension_numbers = #tpu.dot_dimension_numbers<[1], [0], [0], [1], [0, 0, 1, 1], [], []>} : vector<16x128xf32>, vector<128x128xf32>, vector<16x128xf32> -> vector<16x128xf32>
      %c0_17 = arith.constant 0 : index
      %c0_18 = arith.constant 0 : index
      %16 = vector.load %arg6[%c0_17, %c0_18] : memref<1x128xf32, #tpu.memory_space<vmem>>, vector<1x128xf32>
      %17 = vector.broadcast %16 : vector<1x128xf32> to vector<16x128xf32>
      %18 = arith.addf %15, %17 : vector<16x128xf32>
      %c0_19 = arith.constant 0 : index
      %c0_20 = arith.constant 0 : index
      %19 = vector.load %arg7[%c0_19, %c0_20] : memref<128x128xf32, #tpu.memory_space<vmem>>, vector<128x128xf32>
      %cst_21 = arith.constant dense<0.000000e+00> : vector<16x128xf32>
      %20 = tpu.matmul %13, %19, %cst_21 {dimension_numbers = #tpu.dot_dimension_numbers<[1], [0], [0], [1], [0, 0, 1, 1], [], []>} : vector<16x128xf32>, vector<128x128xf32>, vector<16x128xf32> -> vector<16x128xf32>
      %21 = arith.addf %18, %20 : vector<16x128xf32>
      %c0_22 = arith.constant 0 : index
      %c0_23 = arith.constant 0 : index
      %22 = vector.load %arg10[%c0_22, %c0_23] : memref<16x128xf32, #tpu.memory_space<vmem>>, vector<16x128xf32>
      tpu.vector_store %arg10[%c0_22, %c0_23], %21 {strides = array<i32>} : memref<16x128xf32, #tpu.memory_space<vmem>>, vector<16x128xf32>,
      %23 = arith.mulf %21, %21 : vector<16x128xf32>
      %cst_24 = arith.constant dense<0.000000e+00> : vector<16xf32>
      %24 = vector.multi_reduction <add>, %23, %cst_24 [1] : vector<16x128xf32> to vector<16xf32>
      %25 = vector.shape_cast %24 : vector<16xf32> to vector<16x1xf32>
      %cst_25 = arith.constant 1.000000e-24 : f32
      %26 = vector.broadcast %cst_25 : f32 to vector<16x1xf32>
      %27 = arith.maximumf %25, %26 : vector<16x1xf32>
      %28 = math.rsqrt %27 : vector<16x1xf32>
      %29 = vector.broadcast %28 : vector<16x1xf32> to vector<16x128xf32>
      %30 = arith.mulf %21, %29 : vector<16x128xf32>
      %c0_26 = arith.constant 0 : index
      %c0_27 = arith.constant 0 : index
      %31 = vector.load %arg8[%c0_26, %c0_27] : memref<128x128xf32, #tpu.memory_space<vmem>>, vector<128x128xf32>
      %cst_28 = arith.constant dense<0.000000e+00> : vector<16x128xf32>
      %32 = tpu.matmul %30, %31, %cst_28 {dimension_numbers = #tpu.dot_dimension_numbers<[1], [0], [0], [1], [0, 0, 1, 1], [], []>} : vector<16x128xf32>, vector<128x128xf32>, vector<16x128xf32> -> vector<16x128xf32>
      %c0_29 = arith.constant 0 : index
      %c0_30 = arith.constant 0 : index
      %33 = vector.load %arg11[%c0_29, %c0_30] : memref<16x128xf32, #tpu.memory_space<vmem>>, vector<16x128xf32>
      tpu.vector_store %arg11[%c0_29, %c0_30], %32 {strides = array<i32>} : memref<16x128xf32, #tpu.memory_space<vmem>>, vector<16x128xf32>,
      %c0_31 = arith.constant 0 : index
      %c0_32 = arith.constant 0 : index
      %34 = vector.load %arg9[%c0_31, %c0_32] : memref<128x128xf32, #tpu.memory_space<vmem>>, vector<128x128xf32>
      %cst_33 = arith.constant dense<0.000000e+00> : vector<16x128xf32>
      %35 = tpu.matmul %30, %34, %cst_33 {dimension_numbers = #tpu.dot_dimension_numbers<[1], [0], [0], [1], [0, 0, 1, 1], [], []>} : vector<16x128xf32>, vector<128x128xf32>, vector<16x128xf32> -> vector<16x128xf32>
      %c0_34 = arith.constant 0 : index
      %c0_35 = arith.constant 0 : index
      %36 = vector.load %arg12[%c0_34, %c0_35] : memref<16x128xf32, #tpu.memory_space<vmem>>, vector<16x128xf32>
      tpu.vector_store %arg12[%c0_34, %c0_35], %35 {strides = array<i32>} : memref<16x128xf32, #tpu.memory_space<vmem>>, vector<16x128xf32>,
    } else {
    }
    return
  }
  func.func @transform_0(%arg0: i32, %arg1: i32) -> (i32, i32) {
    %c0_i32 = arith.constant 0 : i32
    return %arg0, %arg1 : i32, i32
  }
  func.func @transform_1(%arg0: i32, %arg1: i32) -> (i32, i32) {
    %c0_i32 = arith.constant 0 : i32
    %c0_i32_0 = arith.constant 0 : i32
    return %arg1, %c0_i32 : i32, i32
  }
  func.func @transform_2(%arg0: i32, %arg1: i32) -> (i32, i32) {
    %c0_i32 = arith.constant 0 : i32
    %c0_i32_0 = arith.constant 0 : i32
    return %arg0, %c0_i32 : i32, i32
  }
  func.func @transform_3(%arg0: i32, %arg1: i32) -> (i32, i32) {
    %c0_i32 = arith.constant 0 : i32
    %c0_i32_0 = arith.constant 0 : i32
    %c0_i32_1 = arith.constant 0 : i32
    return %c0_i32, %c0_i32_0 : i32, i32
  }
  func.func @transform_4(%arg0: i32, %arg1: i32) -> (i32, i32) {
    %c0_i32 = arith.constant 0 : i32
    %c0_i32_0 = arith.constant 0 : i32
    %c0_i32_1 = arith.constant 0 : i32
    return %c0_i32, %c0_i32_0 : i32, i32
  }
  func.func @transform_5(%arg0: i32, %arg1: i32) -> (i32, i32) {
    %c0_i32 = arith.constant 0 : i32
    %c0_i32_0 = arith.constant 0 : i32
    %c0_i32_1 = arith.constant 0 : i32
    return %c0_i32, %c0_i32_0 : i32, i32
  }
  func.func @transform_6(%arg0: i32, %arg1: i32) -> (i32, i32) {
    %c0_i32 = arith.constant 0 : i32
    %c0_i32_0 = arith.constant 0 : i32
    %c0_i32_1 = arith.constant 0 : i32
    return %c0_i32, %c0_i32_0 : i32, i32
  }
  func.func @transform_7(%arg0: i32, %arg1: i32) -> (i32, i32) {
    %c0_i32 = arith.constant 0 : i32
    %c0_i32_0 = arith.constant 0 : i32
    %c0_i32_1 = arith.constant 0 : i32
    return %c0_i32, %c0_i32_0 : i32, i32
  }
  func.func @transform_8(%arg0: i32, %arg1: i32) -> (i32, i32) {
    %c0_i32 = arith.constant 0 : i32
    %c0_i32_0 = arith.constant 0 : i32
    return %arg0, %c0_i32 : i32, i32
  }
  func.func @transform_9(%arg0: i32, %arg1: i32) -> (i32, i32) {
    %c0_i32 = arith.constant 0 : i32
    %c0_i32_0 = arith.constant 0 : i32
    return %arg0, %c0_i32 : i32, i32
  }
  func.func @transform_10(%arg0: i32, %arg1: i32) -> (i32, i32) {
    %c0_i32 = arith.constant 0 : i32
    %c0_i32_0 = arith.constant 0 : i32
    return %arg0, %c0_i32 : i32, i32
  }
}

</mosaic_0001>

<bundles_post_ra>
// kernel: tpu_custom_call.1
= control target key start
LH: loop header
LB: loop body
LE: loop exit
PB: predicated region body
PF: predicated region fallthrough
CT: control target
= control target key end

     0   :  { %s2566_s0 = inlined_call_operand.hbm [shape: bf16[128,128], index: 0, kind: input, shape index: {}]   ;;  %s2567_s1 = inlined_call_operand.hbm [shape: bf16[128,128], index: 1, kind: input, shape index: {}]   ;;  %s2568_s2 = inlined_call_operand.hbm [shape: f32[128,128], index: 2, kind: input, shape index: {}]   ;;  %s2569_s3 = inlined_call_operand.hbm [shape: f32[128,128], index: 3, kind: input, shape index: {}]   ;;  %s2570_s4 = inlined_call_operand.vmem [shape: f32[1,128], index: 4, kind: input, shape index: {}]   ;;  %s2571_s5 = inlined_call_operand.hbm [shape: f32[128,128], index: 5, kind: input, shape index: {}]   ;;  %s2572_s6 = inlined_call_operand.hbm [shape: f32[128,128], index: 6, kind: input, shape index: {}]   ;;  %s2573_s7 = inlined_call_operand.hbm [shape: f32[128,128], index: 7, kind: input, shape index: {}]   ;;  %s2574_s8 = inlined_call_operand.hbm [shape: f32[128,128], index: 8, kind: output, shape index: {0}]   ;;  %s2575_s9 = inlined_call_operand.hbm [shape: f32[128,128], index: 9, kind: output, shape index: {1}]   ;;  %s2576_s10 = inlined_call_operand.hbm [shape: f32[128,128], index: 10, kind: output, shape index: {2}]  }
   0x1   :  { %2591 = sst [smem:[#allocation31_spill]] %s2566_s0 }
   0x2   :  { %2592 = sst [smem:[#allocation32_spill]] %s2567_s1 }
   0x3   :  { %2593 = sst [smem:[#allocation33_spill]] %s2571_s5 }
   0x4   :  { %2594 = sst [smem:[#allocation34_spill]] %s2574_s8 }
   0x5   :  { %2595 = sst [smem:[#allocation35_spill]] %s2575_s9 }
   0x6   :  { %2596 = sst [smem:[#allocation36_spill]] %s2576_s10 }
   0x7   :  { %16 = vsyncpa [#allocation4], 0 }
   0x8   :  { %18 = vsyncpa [#allocation4 + $0x1], 0 }
   0x9   :  { %19 = vsyncpa [#allocation7], 0 }
   0xa   :  { %20 = vsyncpa [#allocation11], 0 }
   0xb   :  { %21 = vsyncpa [#allocation14], 0 }
   0xc   :  { %22 = vsyncpa [#allocation5], 0 }
   0xd   :  { %24 = vsyncpa [#allocation5 + $0x1], 0 }
   0xe   :  { %25 = vsyncpa [#allocation17], 0 }
   0xf   :  { %27 = vsyncpa [#allocation17 + $0x1], 0  ;;  %s2188_s13 = smov 0   ;;  %s2190_s14 = smov 0  }
  0x10   :  { %s2192_s15 = smov 0   ;;  %s2194_s16 = smov 0  }
  0x11   :  { %s2196_s17 = smov 0   ;;  %s2198_s18 = smov 0  }
  0x12 LB: > { %2597 = sst [smem:[#allocation27_spill]] %s2093_s13  ;;  %s2219_s19 = sadd.s32 4294967295, %s2113_s18   ;;  %s2113_s18 = sphi %s2198_s18, %s33_s18   ;;  %s2109_s17 = sphi %s2196_s17, %s2637_s17   ;;  %s2105_s16 = sphi %s2194_s16, %s2636_s16   ;;  %s2101_s15 = sphi %s2192_s15, %s2632_s15   ;;  %s2097_s14 = sphi %s2190_s14, %s2635_s14   ;;  %s2093_s13 = sphi %s2188_s13, %s2634_s13  }
  0x13   : > { %2598 = sst [smem:[#allocation28_spill]] %s2101_s15  ;;  %p1331_p0 = scmp.ge.s32.totalorder %s2113_s18, 1 }
  0x14   : > { %p2590_p1 = scmp.eq.s32.totalorder %s2219_s19, 0  ;;  %p313_p2 = scmp.lt.s32.totalorder %s2113_s18, 9 }
  0x15   : > { %s2115_s21 = smov [#allocation6]   ;;  %s2116_s24 = smov [#allocation10]  }
  0x16   : > { %p2224_p3 = pnand %p1331_p0, %p313_p2  ;;  %s328_s22 = sshll.u32 %s2115_s21, 4  ;;  %s329_s22 = int_to_ptr.vmem [resolvable:$true] %s328_s22 }
  0x17   : > { %s357_s25 = sshll.u32 %s2116_s24, 4  ;;  %s1782_s27 = scalar_lea.vmem %s329_s22, 1024  ;;  %s358_s25 = int_to_ptr.vmem [resolvable:$true] %s357_s25 }
  0x18   : > { %p1652_p4 = pneg %p2224_p3  ;;  %p1783_p7 = scmp.ne.s32.totalorder %s329_s22, %s1782_s27 }
  0x19   : > { %p1790_p10 = scmp.lt.s32.totalorder %s329_s22, %s329_s22  ;;  %p1791_p11 = scmp.lt.s32.totalorder %s1782_s27, %s1782_s27 }
  0x1a   : > { %p2232_p5 = pnand %p1652_p4, %p2590_p1 }
  0x1b   : > { %p1792_p12 = por %p1791_p11, %p1790_p10 }
  0x1c   : > { %p2238_p6 = pneg %p2232_p5 }
  0x1e   : > { %p1785_p8 = pnand %p1783_p7, %p2238_p6 }
  0x20   : > { %p1786_p9 = pneg %p1785_p8 }
  0x22   : > { %p1793_p13 = pnand %p1792_p12, %p1786_p9 }
  0x24   : > { %1796 = shalt.err (!%p1793_p13)
}
  0x25   : > { %s2577_s28 = smov 64   ;;  %s2582_s29 = smov 4  }
  0x26   : > { %s2602_s1 = sld [smem:[#allocation32_spill]]  ;;  %s1808_s12 = scalar_lea.vmem %s358_s25, 2048 }
  0x27   : > { %p1809_p0 = scmp.ne.s32.totalorder %s358_s25, %s1808_s12  ;;  %p1816_p7 = scmp.lt.s32.totalorder %s358_s25, %s358_s25 }
  0x28   : > { %p1817_p8 = scmp.lt.s32.totalorder %s1808_s12, %s1808_s12 }
  0x29   : > { %p1811_p2 = pnand %p1809_p0, %p2238_p6 }
  0x2a   : > { %p1818_p9 = por %p1817_p8, %p1816_p7 }
  0x2b   : > { %p1812_p4 = pneg %p1811_p2 }
  0x2c   : > { %1655 = dma.hbm_to_vmem [thread:$0]  (!%p2232_p5), %s2602_s1, 1024, %s329_s22, [#allocation7], %s2577_s28, %s2577_s28, %s2582_s29  }
  0x2d   : > { %p1819_p10 = pnand %p1818_p9, %p1812_p4 }
  0x2f   : > { %1822 = shalt.err (!%p1819_p10)
}
  0x30   : > { %s2578_s21 = smov 128   ;;  %s2580_s22 = smov 8  }
  0x31   : > { %s2603_s5 = sld [smem:[#allocation33_spill]]  ;;  %s2588_s30 = sadd.s32 4294967294, %s2113_s18  }
  0x32   : > { %s45_s11 = sadd.s32 1, %s2109_s17  ;;  %s54_s12 = sadd.s32 1, %s2101_s15 }
  0x33   : > { %p47_p11 = scmp.ge.s32.totalorder %s45_s11, 8  ;;  %p61_p12 = scmp.ne.s32.totalorder %s2101_s15, %s2097_s14 }
  0x34   : > { %p62_p13 = scmp.eq.s32.totalorder %s2113_s18, 0  ;;  %p67_p2 = scmp.ne.s32.totalorder %s2097_s14, %s2093_s13 }
  0x35   : > { %s2639_s11 = smov (%p47_p11, %s45_s11), 0  ;;  %p248_p4 = scmp.eq.s32.totalorder %s2219_s19, 7 }
  0x36   : > { %2604 = sst [smem:[#allocation29_spill]] %s2639_s11  ;;  %p2270_p0 = por %p62_p13, %p61_p12 }
  0x37   : > { %1661 = dma.hbm_to_vmem [thread:$0]  (!%p2232_p5), %s2603_s5, 2048, %s358_s25, [#allocation11], %s2578_s21, %s2578_s21, %s2580_s22  }
  0x38   : > { %s49_s25 = ssub.s32 %s2109_s17, %s2639_s11  ;;  %p2281_p8 = por %p2590_p1, %p67_p2 }
  0x39   : > { %p52_p7 = scmp.eq.s32.totalorder %s49_s25, 0  ;;  %p2285_p9 = por %p248_p4, %p61_p12 }
  0x3a   : > { %p254_p10 = scmp.eq.s32.totalorder %s2588_s30, 7  ;;  %p1690_p13 = scmp.lt.s32.totalorder %s2113_s18, 8 }
  0x3b   : > { %s2292_s21 = scalar_select %p52_p7, %s2101_s15, %s54_s12  }
  0x3c   : > { %p2294_p11 = por %p254_p10, %p67_p2  ;;  %s397_s29 = sand.u32 1, %s2113_s18  }
  0x3d   : > { %2608 = sst [smem:[#allocation30_spill]] %s2292_s21  ;;  %s399_s25 = sand.u32 1, %s2101_s15  }
  0x3e   : > { %s2609_s22 = scalar_select %p2294_p11, 1, 0 }
  0x3f   : > { %s1338_s1 = sshll.u32 %s399_s25, 3  ;;  %s1376_s5 = sshll.u32 %s2109_s17, 7 }
  0x40   : > { %s2610_s0 = sld [smem:[#allocation31_spill]]  ;;  %s401_s9 = scalar_lea.vmem [#allocation3], %s1338_s1 }
  0x41   : > { %s409_s8 = sshll.u32 %s401_s9, 4  ;;  %p2307_p12 = pnand %p1690_p13, %p2270_p0  ;;  %s410_s8 = int_to_ptr.vmem [resolvable:$true] %s409_s8 }
  0x42   : > { %s1341_s30 = sshll.u32 %s399_s25, 4  ;;  %s2311_s21 = scalar_lea.sflag [#allocation4], %s397_s29 }
  0x43   : > { %p1825_p2 = pneg %p2307_p12  ;;  %s1836_s15 = scalar_lea.vmem %s410_s8, 128 }
  0x44   : > { %p1837_p4 = scmp.ne.s32.totalorder %s410_s8, %s1836_s15  ;;  %s2121_s1 = smov [#allocation3]  }
  0x46   : > { %s408_s10 = scalar_lea.hbm %s2610_s0, %s1376_s5  ;;  %p1839_p7 = pnand %p1837_p4, %p1825_p2 }
  0x47   : > { %s1841_s5 = sshll.u32 %s2121_s1, 4  ;;  %s1842_s5 = int_to_ptr.vmem [resolvable:$false] %s1841_s5 }
  0x48   : > { %p1840_p10 = pneg %p1839_p7  ;;  %s1843_s9 = scalar_lea.vmem %s1842_s5, 256 }
  0x49   : > { %p1844_p0 = scmp.lt.s32.totalorder %s410_s8, %s1842_s5  ;;  %p1845_p13 = scmp.lt.s32.totalorder %s1843_s9, %s1836_s15 }
  0x4b   : > { %p1846_p1 = por %p1845_p13, %p1844_p0 }
  0x4d   : > { %p1847_p11 = pnand %p1846_p1, %p1840_p10 }
  0x4f   : > { %1850 = shalt.err (!%p1847_p11)
}
  0x50   : > { %s2612_s13 = smov 4   ;;  %s2613_s28 = smov 64  }
  0x51   : > { %1671 = dma.hbm_to_vmem [thread:$0]  (!%p2307_p12), %s408_s10, 128, %s410_s8, %s2311_s21, %s2613_s28, %s2613_s28, %s2612_s13  }
  0x52   : > { %s423_s29 = scalar_lea.vmem [#allocation8], %s1341_s30  ;;  %s2122_s25 = smov [#allocation9]  }
  0x53   : > { %s2324_s11 = sshll.u32 %s423_s29, 4  ;;  %s341_s1 = sshll.u32 %s2122_s25, 4  ;;  %s342_s1 = int_to_ptr.vmem [resolvable:$true] %s341_s1  ;;  %s431_s11 = int_to_ptr.vmem [resolvable:$true] %s2324_s11 }
  0x54   : > { %s1862_s0 = scalar_lea.vmem %s342_s1, 2048  ;;  %p1870_p11 = scmp.lt.s32.totalorder %s342_s1, %s342_s1 }
  0x55   : > { %p1863_p4 = scmp.ne.s32.totalorder %s342_s1, %s1862_s0  ;;  %p1871_p10 = scmp.lt.s32.totalorder %s1862_s0, %s1862_s0 }
  0x57   : > { %p1865_p7 = pnand %p1863_p4, %p2238_p6  ;;  %p1872_p0 = por %p1871_p10, %p1870_p11 }
  0x59   : > { %p1866_p1 = pneg %p1865_p7 }
  0x5b   : > { %p1873_p13 = pnand %p1872_p0, %p1866_p1 }
  0x5d   : > { %1876 = shalt.err (!%p1873_p13)
}
  0x5e   : > { %s2614_s15 = smov 8   ;;  %s2615_s8 = smov 128  }
  0x5f   : > { %1658 = dma.hbm_to_vmem [thread:$0]  (!%p2232_p5), %s2569_s3, 2048, %s342_s1, [#allocation7], %s2615_s8, %s2615_s8, %s2614_s15  }
  0x60   : > { %s2123_s5 = smov [#allocation12]   ;;  %s2124_s13 = smov [#allocation13]  }
  0x61   : > { %s370_s9 = sshll.u32 %s2123_s5, 4  ;;  %s383_s28 = sshll.u32 %s2124_s13, 4  ;;  %s371_s9 = int_to_ptr.vmem [resolvable:$true] %s370_s9  ;;  %s384_s28 = int_to_ptr.vmem [resolvable:$true] %s383_s28 }
  0x62   : > { %s1888_s29 = scalar_lea.vmem %s371_s9, 2048  ;;  %p1896_p11 = scmp.lt.s32.totalorder %s371_s9, %s371_s9 }
  0x63   : > { %p1889_p4 = scmp.ne.s32.totalorder %s371_s9, %s1888_s29  ;;  %p1897_p10 = scmp.lt.s32.totalorder %s1888_s29, %s1888_s29 }
  0x65   : > { %p1891_p7 = pnand %p1889_p4, %p2238_p6  ;;  %p1898_p0 = por %p1897_p10, %p1896_p11 }
  0x67   : > { %p1892_p1 = pneg %p1891_p7 }
  0x69   : > { %p1899_p13 = pnand %p1898_p0, %p1892_p1 }
  0x6b   : > { %1902 = shalt.err (!%p1899_p13)
}
  0x6c   : > { %1664 = dma.hbm_to_vmem [thread:$0]  (!%p2232_p5), %s2572_s6, 2048, %s371_s9, [#allocation11], %s2615_s8, %s2615_s8, %s2614_s15  }
  0x6d   : > { %s1377_s1 = sshll.u32 %s2109_s17, 8  ;;  %s1914_s10 = scalar_lea.vmem %s384_s28, 2048 }
  0x6e   : > { %p1915_p4 = scmp.ne.s32.totalorder %s384_s28, %s1914_s10  ;;  %p1922_p1 = scmp.lt.s32.totalorder %s384_s28, %s384_s28 }
  0x6f   : > { %p1923_p10 = scmp.lt.s32.totalorder %s1914_s10, %s1914_s10 }
  0x70   : > { %p1917_p7 = pnand %p1915_p4, %p2238_p6 }
  0x71   : > { %p1924_p0 = por %p1923_p10, %p1922_p1 }
  0x72   : > { %p1918_p11 = pneg %p1917_p7 }
  0x74   : > { %p1925_p13 = pnand %p1924_p0, %p1918_p11 }
  0x76   : > { %1928 = shalt.err (!%p1925_p13)
}
  0x77   : > { %1667 = dma.hbm_to_vmem [thread:$0]  (!%p2232_p5), %s2573_s7, 2048, %s384_s28, [#allocation14], %s2615_s8, %s2615_s8, %s2614_s15  }
  0x78   : > { %s429_s13 = scalar_lea.hbm %s2568_s2, %s1377_s1  ;;  %s1942_s29 = scalar_lea.vmem %s431_s11, 256 }
  0x79   : > { %p1943_p6 = scmp.ne.s32.totalorder %s431_s11, %s1942_s29  ;;  %s2125_s23 = smov [#allocation8]  }
  0x7a   : > { %s1947_s0 = sshll.u32 %s2125_s23, 4  ;;  %s1948_s0 = int_to_ptr.vmem [resolvable:$false] %s1947_s0 }
  0x7b   : > { %p1945_p4 = pnand %p1943_p6, %p1825_p2  ;;  %s1949_s25 = scalar_lea.vmem %s1948_s0, 512 }
  0x7c   : > { %p1950_p11 = scmp.lt.s32.totalorder %s431_s11, %s1948_s0  ;;  %p1951_p1 = scmp.lt.s32.totalorder %s1949_s25, %s1942_s29 }
  0x7d   : > { %p1946_p7 = pneg %p1945_p4 }
  0x7e   : > { %p1952_p10 = por %p1951_p1, %p1950_p11 }
  0x80   : > { %p1953_p0 = pnand %p1952_p10, %p1946_p7 }
  0x82   : > { %1956 = shalt.err (!%p1953_p0)
}
  0x83   : > { %1674 = dma.hbm_to_vmem [thread:$0]  (!%p2307_p12), %s429_s13, 256, %s431_s11, %s2311_s21, %s2615_s8, %s2615_s8, %s2614_s15  }
  0x84   : > { %442 = sbr.rel (%p2224_p3) target bundleno = 973 (0x3cd), region = 52  ;;  %s444_s28 = sand.u32 (!%p2224_p3), 1, %s2219_s19  }
  0x85   : > { %s2374_s1 = sand.u32 (!%p2224_p3), 1, %s2097_s14   ;;  %s445_s30 = scalar_lea.sflag (!%p2224_p3), [#allocation4], %s444_s28 }
  0x86   : > { %s1345_s10 = sshll.u32 (!%p2224_p3), %s2374_s1, 3 }
  0x87   : > { %s2379_s12 = scalar_lea.vmem (!%p2224_p3), [#allocation3], %s1345_s10 }
  0x89   : > { %2060 = dma.done.wait (%p2281_p8), %s445_s30, 128  }
  0x8a   : > { %2062 = vsyncadd (%p2281_p8), %s445_s30, 4294967168  ;;  %p2616_p3 = scmp.eq.s32.totalorder %s2219_s19, 0 }
  0x8c   : > { %2064 = dma.done.wait (%p2616_p3), [#allocation7], 1024   ;;  %p2617_p5 = pmov %p2616_p3 }
  0x8d   : > { %s2390_s20 = sshll.u32 %s2374_s1, 4 }
  0x8e   : > { %2066 = vsyncadd (%p2617_p5), [#allocation7], 4294966272  ;;  %s461_s21 = scalar_lea.vmem [#allocation8], %s2390_s20 }
  0x8f   : > { %2068 = dma.done.wait (%p2281_p8), %s445_s30, 256  }
  0x90   : > { %2070 = vsyncadd (%p2281_p8), %s445_s30, 4294967040  ;;  %p2618_p12 = pmov %p2616_p3 }
  0x91   : > { %p2619_p2 = pmov %p2616_p3 }
  0x92   : > { %2072 = dma.done.wait (%p2618_p12), [#allocation7], 2048  }
  0x93   : > { %2074 = vsyncadd (%p2619_p2), [#allocation7], 4294965248  ;;  %p2620_p13 = pmov %p2619_p2 }
  0x94   : > { %p2621_p6 = pmov %p2619_p2 }
  0x95   : > { %2076 = dma.done.wait (%p2620_p13), [#allocation11], 4096  }
  0x96   : > { %2078 = vsyncadd (%p2621_p6), [#allocation11], 4294963200  ;;  %p2622_p4 = pmov %p2619_p2 }
  0x97   : > { %p2623_p7 = pmov %p2619_p2 }
  0x98   : > { %2080 = dma.done.wait (%p2622_p4), [#allocation14], 2048  }
  0x99   : > { %2082 = vsyncadd (%p2623_p7), [#allocation14], 4294965248  ;;  %v2126_v0 = vmov 0.0   ;;  %vm2127_vm0 = vmmov 0   ;;  %v1758_v1 = vld [vmem:[#allocation6 + $0x38] sm:$0xff]   ;;  %v1759_v2 = vld [vmem:[#allocation6 + $0x30] sm:$0xff]  }
  0x9a   : > { %1462 = vmatprep.subr.bf16.mxu0 %v2126_v0  ;;  %1478 = vmatprep.mubr.msk.bf16.mxu0 %vm2127_vm0, %v2126_v0  ;;  %v1760_v3 = vld [vmem:[#allocation6 + $0x28] sm:$0xff]   ;;  %v683_v4 = vld [vmem:[#allocation9 + $0x78] sm:$0xff]  ;;  %v682_v5 = vld [vmem:[#allocation9 + $0x70] sm:$0xff]  ;;  %s2420_s15 = scalar_lea.vmem [#allocation15], %s2390_s20  ;;  %s2438_s5 = sshll.u32 %s2105_s16, 8 }
  0x9b   : > { %1463 = vmatpush3.bf16.msra.mxu0 %v1758_v1  ;;  %v1761_v6 = vld [vmem:[#allocation6 + $0x20] sm:$0xff]   ;;  %1482 = vmatprep.subr.mxu1 %v683_v4  ;;  %v681_v7 = vld [vmem:[#allocation9 + $0x68] sm:$0xff]  ;;  %v1762_v9 = vld [vmem:[#allocation6 + $0x18] sm:$0xff]   ;;  %s1083_s8 = sshll.u32 %s2420_s15, 4  ;;  %s2624_s13 = sld [smem:[#allocation34_spill]]  ;;  %s2435_s8 = int_to_ptr.vmem [resolvable:$true] %s1083_s8 }
  0x9c   : > { %1464 = vmatprep.subr.bf16.mxu0 %v2126_v0  ;;  %1483 = vmatpush3.msra.mxu1 %v683_v4  ;;  %v680_v8 = vld [vmem:[#allocation9 + $0x60] sm:$0xff]  ;;  %v679_v10 = vld [vmem:[#allocation9 + $0x58] sm:$0xff]  ;;  %v678_v11 = vld [vmem:[#allocation9 + $0x50] sm:$0xff]  ;;  %s1060_s0 = scalar_lea.sflag [#allocation5], %s2374_s1  ;;  %s1957_s25 = scalar_lea.vmem %s2435_s8, 256 }
  0x9d   : > { %1484 = vmatprep.subr.mxu1 %v682_v5  ;;  %v1763_v12 = vld [vmem:[#allocation6 + $0x10] sm:$0xff]   ;;  %v677_v13 = vld [vmem:[#allocation9 + $0x48] sm:$0xff]  ;;  %v676_v14 = vld [vmem:[#allocation9 + $0x40] sm:$0xff]  ;;  %p1958_p8 = scmp.ne.s32.totalorder %s2435_s8, %s1957_s25  ;;  %s2128_s10 = smov [#allocation15]  }
  0x9e   : > { %1485 = vmatpush3.msra.mxu1 %v682_v5  ;;  %v1764_v15 = vld [vmem:[#allocation6 + $0x8] sm:$0xff]   ;;  %v675_v16 = vld [vmem:[#allocation9 + $0x38] sm:$0xff]  ;;  %v674_v17 = vld [vmem:[#allocation9 + $0x30] sm:$0xff]  ;;  %s1961_s30 = sshll.u32 %s2128_s10, 4  ;;  %s1962_s30 = int_to_ptr.vmem [resolvable:$false] %s1961_s30 }
  0x9f   : > { %1465 = vmatpush3.bf16.msra.mxu0 %v1759_v2  ;;  %1486 = vmatprep.subr.mxu1 %v681_v7  ;;  %v1765_v18 = vld [vmem:[#allocation6] sm:$0xff]   ;;  %v673_v19 = vld [vmem:[#allocation9 + $0x28] sm:$0xff]  ;;  %v781_v20 = vld [vmem:[#allocation10 + $0x78] sm:$0xff]  ;;  %p1959_p11 = pnand %p1958_p8, %p2285_p9  ;;  %p1964_p10 = scmp.lt.s32.totalorder %s2435_s8, %s1962_s30 }
  0xa0   : > { %1466 = vmatprep.subr.bf16.mxu0 %v2126_v0  ;;  %1487 = vmatpush3.msra.mxu1 %v681_v7  ;;  %v1766_v21 = vld [vmem:[%s2379_s12] sm:$0xff]   ;;  %v672_v22 = vld [vmem:[#allocation9 + $0x20] sm:$0xff]  ;;  %v779_v26 = vld [vmem:[#allocation10 + $0x68] sm:$0xff]  ;;  %s1963_s12 = scalar_lea.vmem %s1962_s30, 512 }
  0xa1   : > { %1488 = vmatprep.subr.mxu1 %v680_v8  ;;  %v671_v23 = vld [vmem:[#allocation9 + $0x18] sm:$0xff]  ;;  %v780_v24 = vld [vmem:[#allocation10 + $0x70] sm:$0xff]  ;;  %v778_v27 = vld [vmem:[#allocation10 + $0x60] sm:$0xff]  ;;  %s2625_s29 = smov %s2624_s13  ;;  %s2444_s23 = scalar_lea.hbm %s2624_s13, %s2438_s5 }
  0xa2   : > { %1489 = vmatpush3.msra.mxu1 %v680_v8  ;;  %v670_v25 = vld [vmem:[#allocation9 + $0x10] sm:$0xff]  ;;  %v777_v28 = vld [vmem:[#allocation10 + $0x58] sm:$0xff]  ;;  %v775_v30 = vld [vmem:[#allocation10 + $0x48] sm:$0xff]  ;;  %p1960_p1 = pneg %p1959_p11  ;;  %p1965_p0 = scmp.lt.s32.totalorder %s1963_s12, %s1957_s25 }
  0xa3   : > { %1467 = vmatpush3.bf16.msra.mxu0 %v1760_v3  ;;  %1490 = vmatprep.subr.mxu1 %v679_v10  ;;  %v776_v29 = vld [vmem:[#allocation10 + $0x50] sm:$0xff]  ;;  %v774_v31 = vld [vmem:[#allocation10 + $0x40] sm:$0xff]  ;;  %v773_v32 = vld [vmem:[#allocation10 + $0x38] sm:$0xff] }
  0xa4   : > { %1468 = vmatprep.subr.bf16.mxu0 %v2126_v0  ;;  %1491 = vmatpush3.msra.mxu1 %v679_v10  ;;  %v772_v33 = vld [vmem:[#allocation10 + $0x30] sm:$0xff]  ;;  %v771_v34 = vld [vmem:[#allocation10 + $0x28] sm:$0xff]  ;;  %v770_v35 = vld [vmem:[#allocation10 + $0x20] sm:$0xff]  ;;  %p1966_p3 = por %p1965_p0, %p1964_p10 }
  0xa5   : > { %1492 = vmatprep.subr.mxu1 %v678_v11  ;;  %v769_v36 = vld [vmem:[#allocation10 + $0x18] sm:$0xff]  ;;  %v768_v37 = vld [vmem:[#allocation10 + $0x10] sm:$0xff]  ;;  %v669_v38 = vld [vmem:[#allocation9 + $0x8] sm:$0xff] }
  0xa6   : > { %1493 = vmatpush3.msra.mxu1 %v678_v11  ;;  %v767_v39 = vld [vmem:[#allocation10 + $0x8] sm:$0xff]  ;;  %v668_v40 = vld [vmem:[#allocation9] sm:$0xff]  ;;  %v888_v48 = vld [vmem:[#allocation12 + $0x78] sm:$0xff]  ;;  %p1967_p5 = pnand %p1966_p3, %p1960_p1 }
  0xa7   : > { %1469 = vmatpush3.bf16.msra.mxu0 %v1761_v6  ;;  %1494 = vmatprep.subr.mxu1 %v677_v13  ;;  %v766_v41 = vld [vmem:[#allocation10] sm:$0xff]  ;;  %v667_v43 = vld [vmem:[%s461_s21 + $0x8] sm:$0xff]  ;;  %v887_v50 = vld [vmem:[#allocation12 + $0x70] sm:$0xff] }
  0xa8   : > { %1470 = vmatprep.subr.bf16.mxu0 %v2126_v0  ;;  %1495 = vmatpush3.msra.mxu1 %v677_v13  ;;  %v666_v42 = vld [vmem:[%s461_s21] sm:$0xff]  ;;  %v981_v49 = vld [vmem:[#allocation13 + $0x78] sm:$0xff]  ;;  %v886_v52 = vld [vmem:[#allocation12 + $0x68] sm:$0xff] }
  0xa9   : > { %1496 = vmatprep.subr.mxu1 %v676_v14  ;;  %v980_v51 = vld [vmem:[#allocation13 + $0x70] sm:$0xff]  ;;  %v979_v53 = vld [vmem:[#allocation13 + $0x68] sm:$0xff]  ;;  %v885_v54 = vld [vmem:[#allocation12 + $0x60] sm:$0xff] }
  0xaa   : > { %1497 = vmatpush3.msra.mxu1 %v676_v14  ;;  %v978_v55 = vld [vmem:[#allocation13 + $0x60] sm:$0xff]  ;;  %v884_v56 = vld [vmem:[#allocation12 + $0x58] sm:$0xff]  ;;  %v1364_v58 = vld [vmem:[%s2570_s4] ss:$0 sm:$0xff] }
  0xab   : > { %1471 = vmatpush3.bf16.msra.mxu0 %v1762_v9  ;;  %1498 = vmatprep.subr.mxu1 %v675_v16  ;;  %v977_v57 = vld [vmem:[#allocation13 + $0x58] sm:$0xff]  ;;  %v883_v5 = vld [vmem:[#allocation12 + $0x50] sm:$0xff]  ;;  %v882_v7 = vld [vmem:[#allocation12 + $0x48] sm:$0xff] }
  0xac   : > { %1472 = vmatprep.subr.bf16.mxu0 %v2126_v0  ;;  %1499 = vmatpush3.msra.mxu1 %v675_v16  ;;  %v976_v6 = vld [vmem:[#allocation13 + $0x50] sm:$0xff]  ;;  %v975_v8 = vld [vmem:[#allocation13 + $0x48] sm:$0xff]  ;;  %v881_v9 = vld [vmem:[#allocation12 + $0x40] sm:$0xff] }
  0xad   : > { %1500 = vmatprep.subr.mxu1 %v674_v17  ;;  %v974_v10 = vld [vmem:[#allocation13 + $0x40] sm:$0xff]  ;;  %v880_v11 = vld [vmem:[#allocation12 + $0x38] sm:$0xff]  ;;  %v879_v13 = vld [vmem:[#allocation12 + $0x30] sm:$0xff] }
  0xae   : > { %1501 = vmatpush3.msra.mxu1 %v674_v17  ;;  %v972_v14 = vld [vmem:[#allocation13 + $0x30] sm:$0xff]  ;;  %v971_v16 = vld [vmem:[#allocation13 + $0x28] sm:$0xff]  ;;  %v877_v17 = vld [vmem:[#allocation12 + $0x20] sm:$0xff] }
  0xaf   : > { %1473 = vmatpush3.bf16.msra.mxu0 %v1763_v12  ;;  %1502 = vmatprep.subr.mxu1 %v673_v19  ;;  %v973_v12 = vld [vmem:[#allocation13 + $0x38] sm:$0xff] }
  0xb0   : > { %1474 = vmatprep.subr.bf16.mxu0 %v2126_v0  ;;  %1503 = vmatpush3.msra.mxu1 %v673_v19  ;;  %v876_v19 = vld [vmem:[#allocation12 + $0x18] sm:$0xff] }
  0xb1   : > { %1504 = vmatprep.subr.mxu1 %v672_v22 }
  0xb2   : > { %1505 = vmatpush3.msra.mxu1 %v672_v22  ;;  %v968_v22 = vld [vmem:[#allocation13 + $0x10] sm:$0xff] }
  0xb3   : > { %1475 = vmatpush3.bf16.msra.mxu0 %v1764_v15  ;;  %1506 = vmatprep.subr.mxu1 %v671_v23  ;;  %v878_v15 = vld [vmem:[#allocation12 + $0x28] sm:$0xff] }
  0xb4   : > { %1476 = vmatprep.subr.bf16.mxu0 %v2126_v0  ;;  %1507 = vmatpush3.msra.mxu1 %v671_v23  ;;  %v874_v23 = vld [vmem:[#allocation12 + $0x8] sm:$0xff] }
  0xb5   : > { %1508 = vmatprep.subr.mxu1 %v670_v25 }
  0xb6   : > { %1509 = vmatpush3.msra.mxu1 %v670_v25  ;;  %v873_v25 = vld [vmem:[#allocation12] sm:$0xff] }
  0xb7   : > { %1477 = vmatpush3.bf16.msra.mxu0 %v1765_v18  ;;  %1510 = vmatprep.subr.mxu1 %v669_v38  ;;  %v970_v18 = vld [vmem:[#allocation13 + $0x20] sm:$0xff] }
  0xb8   : > { %1517 = vmatprep.subr.mxu0 %v781_v20  ;;  %1511 = vmatpush3.msra.mxu1 %v669_v38 }
  0xb9   : > { %1512 = vmatprep.subr.mxu1 %v668_v40 }
  0xba   : > { %1479 = vmatmul.mubr.bf16.vlgmr.msra.gmra.mxu0 %v1766_v21  ;;  %1513 = vmatpush3.msra.mxu1 %v668_v40  ;;  %v875_v21 = vld [vmem:[#allocation12 + $0x10] sm:$0xff] }
  0xbb   : > { %1518 = vmatpush3.msra.mxu0 %v781_v20  ;;  %1549 = vmatprep.mubr.f32.mxu0 %v666_v42  ;;  %v969_v20 = vld [vmem:[#allocation13 + $0x18] sm:$0xff] }
  0xbc   : > { %1519 = vmatprep.subr.mxu0 %v780_v24  ;;  %1552 = vmatprep.subr.mxu1 %v888_v48 }
  0xbd   : > { %1520 = vmatpush3.msra.mxu0 %v780_v24  ;;  %v967_v24 = vld [vmem:[#allocation13 + $0x8] sm:$0xff] }
  0xbe   : > { %1521 = vmatprep.subr.mxu0 %v779_v26 }
  0xbf   : > { %1522 = vmatpush3.msra.mxu0 %v779_v26  ;;  %v966_v26 = vld [vmem:[#allocation13] sm:$0xff] }
  0xc0   : > { %1523 = vmatprep.subr.mxu0 %v778_v27 }
  0xc1   : > { %1524 = vmatpush3.msra.mxu0 %v778_v27 }
  0xc2   : > { %1525 = vmatprep.subr.mxu0 %v777_v28 }
  0xc3   : > { %1526 = vmatpush3.msra.mxu0 %v777_v28 }
  0xc4   : > { %1527 = vmatprep.subr.mxu0 %v776_v29 }
  0xc5   : > { %1528 = vmatpush3.msra.mxu0 %v776_v29 }
  0xc6   : > { %1529 = vmatprep.subr.mxu0 %v775_v30 }
  0xc7   : > { %1530 = vmatpush3.msra.mxu0 %v775_v30 }
  0xc8   : > { %1531 = vmatprep.subr.mxu0 %v774_v31 }
  0xc9   : > { %1532 = vmatpush3.msra.mxu0 %v774_v31 }
  0xca   : > { %1533 = vmatprep.subr.mxu0 %v773_v32 }
  0xcb   : > { %1534 = vmatpush3.msra.mxu0 %v773_v32 }
  0xcc   : > { %1535 = vmatprep.subr.mxu0 %v772_v33 }
  0xcd   : > { %1536 = vmatpush3.msra.mxu0 %v772_v33 }
  0xce   : > { %1537 = vmatprep.subr.mxu0 %v771_v34 }
  0xcf   : > { %1538 = vmatpush3.msra.mxu0 %v771_v34 }
  0xd0   : > { %1539 = vmatprep.subr.mxu0 %v770_v35 }
  0xd1   : > { %1540 = vmatpush3.msra.mxu0 %v770_v35 }
  0xd2   : > { %1541 = vmatprep.subr.mxu0 %v769_v36 }
  0xd3   : > { %1542 = vmatpush3.msra.mxu0 %v769_v36 }
  0xd4   : > { %1543 = vmatprep.subr.mxu0 %v768_v37 }
  0xd5   : > { %1544 = vmatpush3.msra.mxu0 %v768_v37 }
  0xd6   : > { %1545 = vmatprep.subr.mxu0 %v767_v39 }
  0xd7   : > { %1546 = vmatpush3.msra.mxu0 %v767_v39 }
  0xd8   : > { %1547 = vmatprep.subr.mxu0 %v766_v41 }
  0xd9   : > { %1548 = vmatpush3.msra.mxu0 %v766_v41 }
  0xda   : > { %1550 = vmatmul.mubr.f32.vlgmr.msra.gmra.mxu0 %v667_v43  ;;  %1587 = vmatprep.subr.mxu0 %v981_v49 }
  0xdb   : > { %1588 = vmatpush3.msra.mxu0 %v981_v49 }
  0xdc   : > { %1589 = vmatprep.subr.mxu0 %v980_v51 }
  0xdd   : > { %1590 = vmatpush3.msra.mxu0 %v980_v51 }
  0xde   : > { %1591 = vmatprep.subr.mxu0 %v979_v53 }
  0xdf   : > { %1592 = vmatpush3.msra.mxu0 %v979_v53 }
  0xe0   : > { %1593 = vmatprep.subr.mxu0 %v978_v55 }
  0xe1   : > { %1594 = vmatpush3.msra.mxu0 %v978_v55 }
  0xe2   : > { %1595 = vmatprep.subr.mxu0 %v977_v57 }
  0xe3   : > { %1596 = vmatpush3.msra.mxu0 %v977_v57 }
  0xe4   : > { %1597 = vmatprep.subr.mxu0 %v976_v6 }
  0xe5   : > { %1598 = vmatpush3.msra.mxu0 %v976_v6 }
  0xe6   : > { %1599 = vmatprep.subr.mxu0 %v975_v8 }
  0xe7   : > { %1600 = vmatpush3.msra.mxu0 %v975_v8 }
  0xe8   : > { %1601 = vmatprep.subr.mxu0 %v974_v10 }
  0xe9   : > { %1602 = vmatpush3.msra.mxu0 %v974_v10 }
  0xea   : > { %1603 = vmatprep.subr.mxu0 %v973_v12 }
  0xeb   : > { %1604 = vmatpush3.msra.mxu0 %v973_v12 }
  0xec   : > { %1605 = vmatprep.subr.mxu0 %v972_v14 }
  0xed   : > { %1606 = vmatpush3.msra.mxu0 %v972_v14 }
  0xee   : > { %1607 = vmatprep.subr.mxu0 %v971_v16 }
  0xef   : > { %1608 = vmatpush3.msra.mxu0 %v971_v16 }
  0xf0   : > { %1609 = vmatprep.subr.mxu0 %v970_v18 }
  0xf1   : > { %1610 = vmatpush3.msra.mxu0 %v970_v18 }
  0xf2   : > { %1611 = vmatprep.subr.mxu0 %v969_v20 }
  0xf3   : > { %1612 = vmatpush3.msra.mxu0 %v969_v20 }
  0xf4   : > { %1613 = vmatprep.subr.mxu0 %v968_v22 }
  0xf5   : > { %1614 = vmatpush3.msra.mxu0 %v968_v22 }
  0xf6   : > { %1615 = vmatprep.subr.mxu0 %v967_v24 }
  0xf7   : > { %1616 = vmatpush3.msra.mxu0 %v967_v24 }
  0xf8   : > { %1617 = vmatprep.subr.mxu0 %v966_v26 }
  0xf9   : > { %1618 = vmatpush3.msra.mxu0 %v966_v26 }
 0x17a   : > { %v650_v44 = vpop.f32.mrf.mxu0 }
 0x17b   : > { %1514 = vmatprep.mubr.f32.mxu1 %v650_v44 }
 0x17c   : > { %v1480_v45 = vpop.f32.mrf.mxu0 }
 0x17e   : > { %v653_v46 = vpop.f32.mrf.mxu0 }
 0x17f   : > { %1515 = vmatmul.mubr.f32.vlgmr.msra.gmra.mxu1 %v653_v46 }
 0x180   : > { %v1481_v47 = vpop.f32.mrf.mxu0  ;;  %1553 = vmatpush3.msra.mxu1 %v888_v48 }
 0x181   : > { %1554 = vmatprep.subr.mxu1 %v887_v50 }
 0x182   : > { %1555 = vmatpush3.msra.mxu1 %v887_v50 }
 0x183   : > { %1556 = vmatprep.subr.mxu1 %v886_v52 }
 0x184   : > { %1557 = vmatpush3.msra.mxu1 %v886_v52 }
 0x185   : > { %1558 = vmatprep.subr.mxu1 %v885_v54 }
 0x186   : > { %1559 = vmatpush3.msra.mxu1 %v885_v54 }
 0x187   : > { %1560 = vmatprep.subr.mxu1 %v884_v56 }
 0x188   : > { %1561 = vmatpush3.msra.mxu1 %v884_v56 }
 0x189   : > { %1562 = vmatprep.subr.mxu1 %v883_v5 }
 0x18a   : > { %1563 = vmatpush3.msra.mxu1 %v883_v5 }
 0x18b   : > { %1564 = vmatprep.subr.mxu1 %v882_v7 }
 0x18c   : > { %1565 = vmatpush3.msra.mxu1 %v882_v7 }
 0x18d   : > { %1566 = vmatprep.subr.mxu1 %v881_v9 }
 0x18e   : > { %1567 = vmatpush3.msra.mxu1 %v881_v9 }
 0x18f   : > { %1568 = vmatprep.subr.mxu1 %v880_v11 }
 0x190   : > { %1569 = vmatpush3.msra.mxu1 %v880_v11 }
 0x191   : > { %1570 = vmatprep.subr.mxu1 %v879_v13 }
 0x192   : > { %1571 = vmatpush3.msra.mxu1 %v879_v13 }
 0x193   : > { %1572 = vmatprep.subr.mxu1 %v878_v15 }
 0x194   : > { %1573 = vmatpush3.msra.mxu1 %v878_v15 }
 0x195   : > { %1574 = vmatprep.subr.mxu1 %v877_v17 }
 0x196   : > { %1575 = vmatpush3.msra.mxu1 %v877_v17 }
 0x197   : > { %1576 = vmatprep.subr.mxu1 %v876_v19 }
 0x198   : > { %1577 = vmatpush3.msra.mxu1 %v876_v19 }
 0x199   : > { %1578 = vmatprep.subr.mxu1 %v875_v21 }
 0x19a   : > { %v1551_v60 = vpop.f32.mrf.mxu0  ;;  %1579 = vmatpush3.msra.mxu1 %v875_v21 }
 0x19b   : > { %1580 = vmatprep.subr.mxu1 %v874_v23 }
 0x19c   : > { %v848_v1 = vpop.f32.mrf.mxu0  ;;  %1581 = vmatpush3.msra.mxu1 %v874_v23 }
 0x19d   : > { %1582 = vmatprep.subr.mxu1 %v873_v25 }
 0x19e   : > { %1583 = vmatpush3.msra.mxu1 %v873_v25 }
 0x23f   : > { %v1516_v59 = vpop.f32.mrf.mxu1 }
 0x240   : > { %v763_v61 = vadd.f32 %v1516_v59, %v1364_v58 }
 0x241   : > { %v757_v62 = vpop.f32.mrf.mxu1 }
 0x242   : > { %v2417_v63 = vadd.f32 %v1551_v60, %v763_v61  ;;  %v758_v0 = vadd.f32 %v1364_v58, %v757_v62 }
 0x244   : > { %860 = vst [vmem:[%s2420_s15 + $0x8] sm:$0xff] %v2417_v63  ;;  %v2424_v2 = vadd.f32 %v848_v1, %v758_v0  ;;  %v862_v4 = vmul.f32 %v2417_v63, %v2417_v63 }
 0x246   : > { %859 = vst [vmem:[%s2420_s15] sm:$0xff] %v2424_v2  ;;  %v861_v3 = vmul.f32 %v2424_v2, %v2424_v2 }
 0x248   : > { %863 = vadd.xlane.f32.xlu0 %v861_v3 }
 0x24c   : > { %865 = vadd.xlane.f32.xlu0 %v862_v4 }
 0x2d1   : > { %v864_v27 = vpop.xlane.xlu0 %863 }
 0x2d2   : > { %v867_v28 = vmax.f32 %v864_v27, 1e-24 }
 0x2d4   : > { %1767 = vrsqrt.f32 %v867_v28 }
 0x2d5   : > { %v866_v29 = vpop.xlane.xlu0 %865 }
 0x2d6   : > { %v868_v30 = vmax.f32 %v866_v29, 1e-24 }
 0x2d8   : > { %1769 = vrsqrt.f32 %v868_v30 }
 0x2e1   : > { %v1768_v31 = vpop.eup %1767 }
 0x2e2   : > { %v871_v32 = vmul.f32 %v1768_v31, %v2424_v2 }
 0x2e4   : > { %1584 = vmatprep.mubr.f32.mxu1 %v871_v32  ;;  %1619 = vmatprep.mubr.f32.mxu0 %v871_v32 }
 0x2e5   : > { %v1770_v33 = vpop.eup %1769 }
 0x2e6   : > { %v872_v34 = vmul.f32 %v1770_v33, %v2417_v63 }
 0x2e8   : > { %1585 = vmatmul.mubr.f32.vlgmr.msra.gmra.mxu1 %v872_v34  ;;  %1620 = vmatmul.mubr.f32.vlgmr.msra.gmra.mxu0 %v872_v34 }
 0x2e9   : > { %1970 = shalt.err (!%p1967_p5)
}
 0x2ea   : > { %s1971_s16 = scalar_lea.hbm %s2444_s23, 256  ;;  %s1975_s11 = scalar_lea.hbm %s2625_s29, 2048 }
 0x2eb   : > { %p1972_p12 = scmp.ne.s32.totalorder %s2444_s23, %s1971_s16  ;;  %p1976_p6 = scmp.lt.s32.totalorder %s2444_s23, %s2625_s29 }
 0x2ec   : > { %p1977_p4 = scmp.lt.s32.totalorder %s1975_s11, %s1971_s16 }
 0x2ed   : > { %p1973_p2 = pnand %p1972_p12, %p2285_p9 }
 0x2ee   : > { %p1978_p7 = por %p1977_p4, %p1976_p6 }
 0x2ef   : > { %p1974_p13 = pneg %p1973_p2 }
 0x2f1   : > { %p1979_p8 = pnand %p1978_p7, %p1974_p13 }
 0x2f3   : > { %1982 = shalt.err (!%p1979_p8)
}
 0x2f4   : > { %s2129_s26 = smov 128   ;;  %s2130_s13 = smov 8  }
 0x2f5   : > { %1646 = dma.vmem_to_hbm [thread:$0]  (%p2285_p9), %s2435_s8, 256, %s2444_s23, %s1060_s0, %s2129_s26, %s2129_s26, %s2130_s13  }
 0x2f6   : > { %s521_s25 = scalar_lea.vmem [#allocation16], %s2390_s20  ;;  %s528_s30 = scalar_lea.vmem [#allocation18], %s2390_s20 }
 0x2f7   : > { %s1099_s10 = sshll.u32 %s521_s25, 4  ;;  %s1115_s12 = sshll.u32 %s528_s30, 4  ;;  %s2474_s10 = int_to_ptr.vmem [resolvable:$true] %s1099_s10  ;;  %s2482_s12 = int_to_ptr.vmem [resolvable:$true] %s1115_s12 }
 0x2f8   : > { %s2626_s24 = sld [smem:[#allocation35_spill]]  ;;  %s2492_s0 = scalar_lea.sflag [#allocation17], %s444_s28 }
 0x2f9   : > { %s2627_s8 = sld [smem:[#allocation36_spill]]  ;;  %s1983_s15 = scalar_lea.vmem %s2474_s10, 256 }
 0x2fa   : > { %p1984_p11 = scmp.ne.s32.totalorder %s2474_s10, %s1983_s15  ;;  %s2131_s9 = smov [#allocation16]  }
 0x2fb   : > { %s1987_s16 = sshll.u32 %s2131_s9, 4  ;;  %s1988_s16 = int_to_ptr.vmem [resolvable:$false] %s1987_s16 }
 0x2fc   : > { %p1985_p1 = pnand %p1984_p11, %p2285_p9  ;;  %s1989_s21 = scalar_lea.vmem %s1988_s16, 512 }
 0x2fd   : > { %p1990_p0 = scmp.lt.s32.totalorder %s2474_s10, %s1988_s16  ;;  %p1991_p3 = scmp.lt.s32.totalorder %s1989_s21, %s1983_s15 }
 0x2fe   : > { %s2480_s11 = scalar_lea.hbm %s2626_s24, %s2438_s5  ;;  %p1986_p10 = pneg %p1985_p1 }
 0x2ff   : > { %s2488_s23 = scalar_lea.hbm %s2627_s8, %s2438_s5  ;;  %p1992_p5 = por %p1991_p3, %p1990_p0 }
 0x301   : > { %p1993_p12 = pnand %p1992_p5, %p1986_p10 }
 0x3a8   : > { %v1586_v35 = vpop.f32.mrf.mxu1  ;;  %v1621_v36 = vpop.f32.mrf.mxu0 }
 0x3a9   : > { %965 = vst [vmem:[%s521_s25 + $0x8] sm:$0xff] %v1586_v35  ;;  %1058 = vst [vmem:[%s528_s30 + $0x8] sm:$0xff] %v1621_v36 }
 0x3aa   : > { %v955_v37 = vpop.f32.mrf.mxu1  ;;  %v1048_v38 = vpop.f32.mrf.mxu0 }
 0x3ab   : > { %964 = vst [vmem:[%s521_s25] sm:$0xff] %v955_v37  ;;  %1057 = vst [vmem:[%s528_s30] sm:$0xff] %v1048_v38 }
 0x3ac   : > { %1996 = shalt.err (!%p1993_p12)
}
 0x3ad   : > { %s1997_s19 = scalar_lea.hbm %s2480_s11, 256  ;;  %s2001_s25 = scalar_lea.hbm %s2626_s24, 2048 }
 0x3ae   : > { %p1998_p2 = scmp.ne.s32.totalorder %s2480_s11, %s1997_s19  ;;  %p2002_p4 = scmp.lt.s32.totalorder %s2480_s11, %s2626_s24 }
 0x3af   : > { %p2003_p7 = scmp.lt.s32.totalorder %s2001_s25, %s1997_s19 }
 0x3b0   : > { %p1999_p13 = pnand %p1998_p2, %p2285_p9 }
 0x3b1   : > { %p2004_p8 = por %p2003_p7, %p2002_p4 }
 0x3b2   : > { %p2000_p6 = pneg %p1999_p13 }
 0x3b4   : > { %p2005_p11 = pnand %p2004_p8, %p2000_p6 }
 0x3b6   : > { %2008 = shalt.err (!%p2005_p11)
}
 0x3b7   : > { %1647 = dma.vmem_to_hbm [thread:$0]  (%p2285_p9), %s2474_s10, 256, %s2480_s11, %s2492_s0, %s2129_s26, %s2129_s26, %s2130_s13  }
 0x3b8   : > { %s2009_s20 = scalar_lea.vmem %s2482_s12, 256  ;;  %s2132_s15 = smov [#allocation18]  }
 0x3b9   : > { %p2010_p1 = scmp.ne.s32.totalorder %s2482_s12, %s2009_s20  ;;  %s2013_s9 = sshll.u32 %s2132_s15, 4  ;;  %s2014_s9 = int_to_ptr.vmem [resolvable:$false] %s2013_s9 }
 0x3ba   : > { %s2015_s16 = scalar_lea.vmem %s2014_s9, 512  ;;  %p2016_p3 = scmp.lt.s32.totalorder %s2482_s12, %s2014_s9 }
 0x3bb   : > { %p2011_p10 = pnand %p2010_p1, %p2285_p9  ;;  %p2017_p5 = scmp.lt.s32.totalorder %s2015_s16, %s2009_s20 }
 0x3bd   : > { %p2012_p0 = pneg %p2011_p10  ;;  %p2018_p12 = por %p2017_p5, %p2016_p3 }
 0x3bf   : > { %p2019_p2 = pnand %p2018_p12, %p2012_p0 }
 0x3c1   : > { %2022 = shalt.err (!%p2019_p2)
}
 0x3c2   : > { %s2023_s21 = scalar_lea.hbm %s2488_s23, 256  ;;  %s2027_s19 = scalar_lea.hbm %s2627_s8, 2048 }
 0x3c3   : > { %p2024_p13 = scmp.ne.s32.totalorder %s2488_s23, %s2023_s21  ;;  %p2028_p7 = scmp.lt.s32.totalorder %s2488_s23, %s2627_s8 }
 0x3c4   : > { %p2029_p8 = scmp.lt.s32.totalorder %s2027_s19, %s2023_s21 }
 0x3c5   : > { %p2025_p6 = pnand %p2024_p13, %p2285_p9 }
 0x3c6   : > { %p2030_p11 = por %p2029_p8, %p2028_p7 }
 0x3c7   : > { %p2026_p4 = pneg %p2025_p6 }
 0x3c9   : > { %p2031_p1 = pnand %p2030_p11, %p2026_p4 }
 0x3cb   : > { %2034 = shalt.err (!%p2031_p1)
}
 0x3cc   : > { %1648 = dma.vmem_to_hbm [thread:$0]  (%p2285_p9), %s2482_s12, 256, %s2488_s23, %s2492_s0, %s2129_s26, %s2129_s26, %s2130_s13  }
 0x3cd PF: > { %s2628_s25 = sld [smem:[#allocation27_spill]]  ;;  %p1696_p10 = scmp.ge.s32.totalorder %s2113_s18, 2 }
 0x3ce   : > { %p2629_p0 = scmp.ne.s32.totalorder %s2609_s22, 0 }
 0x3d0   : > { %p1676_p3 = pnand %p1696_p10, %p2629_p0 }
 0x3d2   : > { %p1677_p5 = pneg %p1676_p3 }
 0x3d3   : > { %s1130_s30 = sand.u32 1, %s2628_s25  }
 0x3d4   : > { %s1131_s1 = scalar_lea.sflag [#allocation5], %s1130_s30 }
 0x3d5   : > { %2084 = dma.done.wait (%p1677_p5), %s1131_s1, 256  }
 0x3d6   : > { %2086 = vsyncadd (%p1677_p5), %s1131_s1, 4294967040  ;;  %s2630_s27 = sadd.s32 4294967294, %s2113_s18  }
 0x3d7   : > { %s1139_s20 = sand.u32 1, %s2630_s27  }
 0x3d8   : > { %s1140_s15 = scalar_lea.sflag [#allocation17], %s1139_s20 }
 0x3d9   : > { %2088 = dma.done.wait (%p1677_p5), %s1140_s15, 512  }
 0x3da   : > { %2090 = vsyncadd (%p1677_p5), %s1140_s15, 4294966784  ;;  %s33_s18 = sadd.s32 1, %s2113_s18   ;;  %s2631_s26 = sld [smem:[#allocation28_spill]] }
 0x3db   : > { %p30_p9 = scmp.ge.s32.totalorder %s33_s18, 10   ;;  %s2632_s15 = sld [smem:[#allocation30_spill]] }
 0x3dc   : > { %s2633_s12 = sld [smem:[#allocation29_spill]]  ;;  %s2634_s13 = smov %s2097_s14 }
 0x3dd   : > { %s2636_s16 = smov %s2109_s17 }
 0x3de   :  { %32 = sbr.rel (!%p30_p9) target bundleno = 18 (0x12), region = 169 }
 0x3e0   : > { %s2635_s14 = smov %s2631_s26 }
 0x3e2   : > { %s2637_s17 = smov %s2633_s12 }
 0x3e3   :  { %1154 = vsyncpa [#allocation4], 1 }
 0x3e4   :  { %1156 = vsyncpa [#allocation4 + $0x1], 1 }
 0x3e5   :  { %1157 = vsyncpa [#allocation7], 1 }
 0x3e6   :  { %1158 = vsyncpa [#allocation11], 1 }
 0x3e7   :  { %1159 = vsyncpa [#allocation14], 1 }
 0x3e8   :  { %1160 = vsyncpa [#allocation5], 1 }
 0x3e9   :  { %1162 = vsyncpa [#allocation5 + $0x1], 1 }
 0x3ea   :  { %1163 = vsyncpa [#allocation17], 1 }
 0x3eb   :  { %1165 = vsyncpa [#allocation17 + $0x1], 1 }

</bundles_post_ra>
